<compile_context>
chip_gen: v7x
topology: tpu7x:2x2x1
jax: 0.10.0
libtpu: 0.0.40
codegen_flags: <defaults>
</compile_context>

<pallas_src>
import jax
import jax.numpy as jnp
from jax.experimental import pallas as pl
from jax.experimental.pallas import tpu as pltpu

EPS = 1e-5          # PyTorch default eps for BatchNorm1d / LayerNorm
LANE = 128
SUBLANE = 8

# Scoped-VMEM limit (safe on v5e/v6e: 128 MiB physical, and v7x: 64 MiB physical)
# and the portion of it we allow the pipelined streaming blocks to occupy
# (input + output, each double-buffered).
_VMEM_LIMIT = 48 * 1024 * 1024
_BLOCK_BUDGET = 32 * 1024 * 1024


def _round_up(x, m):
    return (x + m - 1) // m * m


def _tile(total, unit, cap):
    """Pick (tile, padded_total): tile is a multiple of `unit`, <= cap, sized so the
    grid splits the padded extent into near-equal steps (big blocks, minimal padding)."""
    cap = max(unit, cap // unit * unit)
    total_r = _round_up(max(int(total), 1), unit)
    steps = -(-total_r // cap)                    # ceil div
    tile = _round_up(-(-total_r // steps), unit)  # <= cap by construction
    return tile, _round_up(total_r, tile)


def _params(dim_sem):
    return pltpu.CompilerParams(dimension_semantics=dim_sem,
                                vmem_limit_bytes=_VMEM_LIMIT)


def _f32(x):
    return x if x.dtype == jnp.float32 else x.astype(jnp.float32)


# ----------------------------- kernels ---------------------------------------

def _layernorm_kernel(x_ref, gb_ref, o_ref):
    # Per-row statistics over the feature (lane) axis.
    x = _f32(x_ref[...])
    mean = jnp.mean(x, axis=-1, keepdims=True)               # (TN, 1)
    var = jnp.mean((x - mean) ** 2, axis=-1, keepdims=True)  # (TN, 1)
    inv = jax.lax.rsqrt(var + EPS)
    y = (x - mean) * inv * gb_ref[0:1, :] + gb_ref[1:2, :]
    o_ref[...] = y.astype(o_ref.dtype)


def _batchnorm_resident_kernel(x_ref, gb_ref, o_ref):
    # All N rows of this feature slab are resident: single pass over x in VMEM
    # (sum / sum-of-squares), then one fused scale + shift.
    x = _f32(x_ref[...])
    inv_n = 1.0 / x.shape[0]
    mean = jnp.sum(x, axis=0, keepdims=True) * inv_n                        # (1, TD)
    var = jnp.maximum(jnp.sum(x * x, axis=0, keepdims=True) * inv_n
                      - mean * mean, 0.0)                                   # (1, TD)
    inv = jax.lax.rsqrt(var + EPS)
    scale = gb_ref[0:1, :] * inv
    shift = gb_ref[1:2, :] - mean * scale
    o_ref[...] = (x * scale + shift).astype(o_ref.dtype)


def _batchnorm_stats_kernel(x_ref, stats_ref):
    # Accumulate per-feature sum / sum-of-squares across the (arbitrary) row axis.
    @pl.when(pl.program_id(1) == 0)
    def _():
        stats_ref[...] = jnp.zeros_like(stats_ref)

    x = _f32(x_ref[...])
    s = jnp.sum(x, axis=0, keepdims=True)       # (1, TD)
    sq = jnp.sum(x * x, axis=0, keepdims=True)  # (1, TD)
    stats_ref[...] += jnp.concatenate([s, sq], axis=0)


def _affine_kernel(x_ref, ss_ref, o_ref):
    # y = x * scale + shift (per-feature), fully parallel streaming pass.
    y = _f32(x_ref[...]) * ss_ref[0:1, :] + ss_ref[1:2, :]
    o_ref[...] = y.astype(o_ref.dtype)


# ----------------------------- wrappers --------------------------------------

def _layernorm(x, gb):
    N, D = x.shape
    # 4 live f32 buffers of (TN, D): in + out, each double-buffered.
    tn_cap = min(1024, _BLOCK_BUDGET // (4 * D * 4))
    TN, Np = _tile(N, SUBLANE, tn_cap)
    if Np != N:
        x = jnp.pad(x, ((0, Np - N), (0, 0)))   # padded rows normalized independently, cropped
    y = pl.pallas_call(
        _layernorm_kernel,
        out_shape=jax.ShapeDtypeStruct((Np, D), x.dtype),
        grid=(Np // TN,),
        in_specs=[
            pl.BlockSpec((TN, D), lambda i: (i, 0)),
            pl.BlockSpec((2, D), lambda i: (0, 0)),
        ],
        out_specs=pl.BlockSpec((TN, D), lambda i: (i, 0)),
        compiler_params=_params(("parallel",)),
    )(x, gb)
    return y[:N] if Np != N else y


def _batchnorm(x, gb, force_two_pass=False):
    N, D = x.shape

    # --- Path 1: all N rows of one feature slab fit comfortably in VMEM ------
    # 4 live f32 buffers of (N, TD): in + out, each double-buffered.
    td_budget = (_BLOCK_BUDGET // (4 * N * 4)) // LANE * LANE
    if td_budget >= LANE and not force_two_pass:
        TD, Dp = _tile(D, LANE, min(2048, td_budget))
        xp, gbp = x, gb
        if Dp != D:
            xp = jnp.pad(x, ((0, 0), (0, Dp - D)))
            gbp = jnp.pad(gb, ((0, 0), (0, Dp - D)))
        y = pl.pallas_call(
            _batchnorm_resident_kernel,
            out_shape=jax.ShapeDtypeStruct((N, Dp), x.dtype),
            grid=(Dp // TD,),
            in_specs=[
                pl.BlockSpec((N, TD), lambda j: (0, j)),
                pl.BlockSpec((2, TD), lambda j: (0, j)),
            ],
            out_specs=pl.BlockSpec((N, TD), lambda j: (0, j)),
            compiler_params=_params(("parallel",)),
        )(xp, gbp)
        return y[:, :D] if Dp != D else y

    # --- Path 2 (large N, v7x-safe): two-pass accumulator ---------------------
    # Pass 1 reduces per-feature sum / sum-of-squares over row tiles (reduction
    # grid axis last, marked "arbitrary"); the tiny (2, D) stats become a fused
    # scale/shift in plain JAX; pass 2 streams x once more and applies the affine.
    TD, Dp = _tile(D, LANE, 512)
    tn_cap = min(1024, _BLOCK_BUDGET // (4 * TD * 4))
    TN, Np = _tile(N, SUBLANE, tn_cap)
    xp, gbp = x, gb
    if Dp != D or Np != N:
        xp = jnp.pad(x, ((0, Np - N), (0, Dp - D)))   # zero rows don't perturb the sums
        gbp = jnp.pad(gb, ((0, 0), (0, Dp - D)))

    stats = pl.pallas_call(
        _batchnorm_stats_kernel,
        out_shape=jax.ShapeDtypeStruct((2, Dp), jnp.float32),
        grid=(Dp // TD, Np // TN),
        in_specs=[pl.BlockSpec((TN, TD), lambda j, i: (i, j))],
        out_specs=pl.BlockSpec((2, TD), lambda j, i: (0, j)),
        compiler_params=_params(("parallel", "arbitrary")),
    )(xp)

    mean = stats[0:1] / N
    var = jnp.maximum(stats[1:2] / N - mean * mean, 0.0)
    inv = jax.lax.rsqrt(var + EPS)
    scale = gbp[0:1] * inv
    shift = gbp[1:2] - mean * scale
    ss = jnp.concatenate([scale, shift], axis=0).astype(jnp.float32)

    y = pl.pallas_call(
        _affine_kernel,
        out_shape=jax.ShapeDtypeStruct((Np, Dp), x.dtype),
        grid=(Np // TN, Dp // TD),
        in_specs=[
            pl.BlockSpec((TN, TD), lambda i, j: (i, j)),
            pl.BlockSpec((2, TD), lambda i, j: (0, j)),
        ],
        out_specs=pl.BlockSpec((TN, TD), lambda i, j: (i, j)),
        compiler_params=_params(("parallel", "parallel")),
    )(xp, ss)
    return y[:N, :D] if (Dp != D or Np != N) else y


def normalize(x, gamma=None, beta=None, method="batch"):
    """Forward pass of Normalize. x: (N, D); gamma/beta: (1, D) affine params."""
    if method not in ("batch", "layer"):
        # Normalize() with dim=None -> identity (no kernel needed).
        return x
    N, D = x.shape
    gb = jnp.concatenate(
        [jnp.reshape(gamma, (1, D)), jnp.reshape(beta, (1, D))], axis=0
    ).astype(jnp.float32)
    if method == "batch":
        return _batchnorm(x, gb)
    return _layernorm(x, gb)


# ----------------------------- references / tests ----------------------------

def _batchnorm_ref(x, gamma, beta):
    mean = jnp.mean(x, axis=0, keepdims=True)
    var = jnp.mean((x - mean) ** 2, axis=0, keepdims=True)
    return (x - mean) * jax.lax.rsqrt(var + EPS) * gamma + beta


def _layernorm_ref(x, gamma, beta):
    mean = jnp.mean(x, axis=-1, keepdims=True)
    var = jnp.mean((x - mean) ** 2, axis=-1, keepdims=True)
    return (x - mean) * jax.lax.rsqrt(var + EPS) * gamma + beta


if __name__ == "__main__":
    key = jax.random.PRNGKey(0)

    # --- Small aligned shape (batch, dim) implied by the module --------------
    N, D = 8, 256
    kx, kg, kb = jax.random.split(key, 3)
    x = jax.random.normal(kx, (N, D), dtype=jnp.float32)
    gamma = 1.0 + 0.1 * jax.random.normal(kg, (1, D), dtype=jnp.float32)
    beta = 0.05 * jax.random.normal(kb, (1, D), dtype=jnp.float32)

    y_bn = normalize(x, gamma, beta, method="batch")
    jax.block_until_ready(y_bn)
    assert jnp.allclose(y_bn, _batchnorm_ref(x, gamma, beta), atol=1e-4, rtol=1e-4)

    y_ln = normalize(x, gamma, beta, method="layer")
    jax.block_until_ready(y_ln)
    assert jnp.allclose(y_ln, _layernorm_ref(x, gamma, beta), atol=1e-4, rtol=1e-4)

    # --- Non-aligned shapes (exercise explicit padding paths) ----------------
    N2, D2 = 13, 200
    kx2, kg2, kb2 = jax.random.split(jax.random.PRNGKey(1), 3)
    x2 = jax.random.normal(kx2, (N2, D2), dtype=jnp.float32)
    g2 = 1.0 + 0.1 * jax.random.normal(kg2, (1, D2), dtype=jnp.float32)
    b2 = 0.05 * jax.random.normal(kb2, (1, D2), dtype=jnp.float32)

    y_bn2 = normalize(x2, g2, b2, method="batch")
    y_ln2 = normalize(x2, g2, b2, method="layer")
    jax.block_until_ready((y_bn2, y_ln2))
    assert jnp.allclose(y_bn2, _batchnorm_ref(x2, g2, b2), atol=1e-4, rtol=1e-4)
    assert jnp.allclose(y_ln2, _layernorm_ref(x2, g2, b2), atol=1e-4, rtol=1e-4)

    # --- Large-N (v7x-safe) two-pass BatchNorm path, forced at small shape ----
    gb2 = jnp.concatenate([g2, b2], axis=0)
    y_bn2_acc = _batchnorm(x2, gb2, force_two_pass=True)
    jax.block_until_ready(y_bn2_acc)
    assert jnp.allclose(y_bn2_acc, _batchnorm_ref(x2, g2, b2), atol=1e-4, rtol=1e-4)

    # --- Identity -------------------------------------------------------------
    y_id = normalize(x, gamma, beta, method=None)
    jax.block_until_ready(y_id)
    assert jnp.array_equal(y_id, x)

    print("KERNEL_OK")
</pallas_src>

<mosaic_0001>
module attributes {stable_mosaic.version = 11 : i64} {
  func.func @_batchnorm_resident_kernel(%arg0: i32, %arg1: memref<8x256xf32, #tpu.memory_space<vmem>>, %arg2: memref<2x256xf32, #tpu.memory_space<vmem>>, %arg3: memref<8x256xf32, #tpu.memory_space<vmem>>) attributes {dimension_semantics = [#tpu.dimension_semantics<parallel>], iteration_bounds = array<i64: 1>, scalar_prefetch = 0 : i64, scratch_operands = 0 : i64, tpu.core_type = #tpu.core_type<tc>, window_params = [{transform_indices = @transform_0, window_bounds = array<i64: 8, 256>}, {transform_indices = @transform_1, window_bounds = array<i64: 2, 256>}, {transform_indices = @transform_2, window_bounds = array<i64: 8, 256>}]} {
    %c0 = arith.constant 0 : index
    %c0_0 = arith.constant 0 : index
    %0 = vector.load %arg1[%c0, %c0_0] : memref<8x256xf32, #tpu.memory_space<vmem>>, vector<8x256xf32>
    %cst = arith.constant dense<0.000000e+00> : vector<256xf32>
    %1 = vector.multi_reduction <add>, %0, %cst [0] : vector<8x256xf32> to vector<256xf32>
    %2 = vector.shape_cast %1 : vector<256xf32> to vector<1x256xf32>
    %cst_1 = arith.constant 1.250000e-01 : f32
    %3 = vector.broadcast %cst_1 : f32 to vector<1x256xf32>
    %4 = arith.mulf %2, %3 : vector<1x256xf32>
    %5 = arith.mulf %0, %0 : vector<8x256xf32>
    %cst_2 = arith.constant dense<0.000000e+00> : vector<256xf32>
    %6 = vector.multi_reduction <add>, %5, %cst_2 [0] : vector<8x256xf32> to vector<256xf32>
    %7 = vector.shape_cast %6 : vector<256xf32> to vector<1x256xf32>
    %cst_3 = arith.constant 1.250000e-01 : f32
    %8 = vector.broadcast %cst_3 : f32 to vector<1x256xf32>
    %9 = arith.mulf %7, %8 : vector<1x256xf32>
    %10 = arith.mulf %4, %4 : vector<1x256xf32>
    %11 = arith.subf %9, %10 : vector<1x256xf32>
    %cst_4 = arith.constant 0.000000e+00 : f32
    %12 = vector.broadcast %cst_4 : f32 to vector<1x256xf32>
    %13 = arith.maximumf %11, %12 : vector<1x256xf32>
    %cst_5 = arith.constant 9.99999974E-6 : f32
    %14 = vector.broadcast %cst_5 : f32 to vector<1x256xf32>
    %15 = arith.addf %13, %14 : vector<1x256xf32>
    %16 = math.rsqrt %15 : vector<1x256xf32>
    %c0_6 = arith.constant 0 : index
    %c0_7 = arith.constant 0 : index
    %17 = vector.load %arg2[%c0_6, %c0_7] : memref<2x256xf32, #tpu.memory_space<vmem>>, vector<1x256xf32>
    %18 = arith.mulf %17, %16 : vector<1x256xf32>
    %c1 = arith.constant 1 : index
    %c0_8 = arith.constant 0 : index
    %19 = vector.load %arg2[%c1, %c0_8] : memref<2x256xf32, #tpu.memory_space<vmem>>, vector<1x256xf32>
    %20 = arith.mulf %4, %18 : vector<1x256xf32>
    %21 = arith.subf %19, %20 : vector<1x256xf32>
    %22 = vector.broadcast %18 : vector<1x256xf32> to vector<8x256xf32>
    %23 = arith.mulf %0, %22 : vector<8x256xf32>
    %24 = vector.broadcast %21 : vector<1x256xf32> to vector<8x256xf32>
    %25 = arith.addf %23, %24 : vector<8x256xf32>
    %c0_9 = arith.constant 0 : index
    %c0_10 = arith.constant 0 : index
    %26 = vector.load %arg3[%c0_9, %c0_10] : memref<8x256xf32, #tpu.memory_space<vmem>>, vector<8x256xf32>
    tpu.vector_store %arg3[%c0_9, %c0_10], %25 {strides = array<i32>} : memref<8x256xf32, #tpu.memory_space<vmem>>, vector<8x256xf32>,
    return
  }
  func.func @transform_0(%arg0: i32) -> (i32, i32) {
    %c0_i32 = arith.constant 0 : i32
    %c0_i32_0 = arith.constant 0 : i32
    return %c0_i32, %arg0 : i32, i32
  }
  func.func @transform_1(%arg0: i32) -> (i32, i32) {
    %c0_i32 = arith.constant 0 : i32
    %c0_i32_0 = arith.constant 0 : i32
    return %c0_i32, %arg0 : i32, i32
  }
  func.func @transform_2(%arg0: i32) -> (i32, i32) {
    %c0_i32 = arith.constant 0 : i32
    %c0_i32_0 = arith.constant 0 : i32
    return %c0_i32, %arg0 : i32, i32
  }
}

</mosaic_0001>

<bundles_post_ra>
// kernel: tpu_custom_call.1
= control target key start
LH: loop header
LB: loop body
LE: loop exit
PB: predicated region body
PF: predicated region fallthrough
CT: control target
= control target key end

     0   :  { %7 = vsyncpa [#allocation3], 0  ;;  %s314_s0 = inlined_call_operand.hbm [shape: f32[8,256], index: 0, kind: input, shape index: {}]   ;;  %s315_s1 = inlined_call_operand.hbm [shape: f32[2,256], index: 1, kind: input, shape index: {}]   ;;  %s316_s2 = inlined_call_operand.hbm [shape: f32[8,256], index: 2, kind: output, shape index: {}]  }
   0x1   :  { %8 = vsyncpa [#allocation6], 0 }
   0x2   :  { %9 = vsyncpa [#allocation4], 0  ;;  %s245_s9 = smov [#allocation2]   ;;  %s246_s11 = smov [#allocation5]  }
   0x3   :  { %s16_s10 = sshll.u32 %s245_s9, 4  ;;  %s26_s12 = sshll.u32 %s246_s11, 4  ;;  %s17_s10 = int_to_ptr.vmem [resolvable:$true] %s16_s10  ;;  %s27_s12 = int_to_ptr.vmem [resolvable:$true] %s26_s12 }
   0x4   :  { %s173_s15 = scalar_lea.hbm %s314_s0, 256 }
   0x5   :  { %p174_p0 = scmp.ne.s32.totalorder %s314_s0, %s173_s15  ;;  %p177_p1 = scmp.lt.u32.totalorder %s173_s15, %s314_s0 }
   0x7   :  { %p179_p2 = pnand %p177_p1, %p174_p0 }
   0x9   :  { %182 = shalt.err (!%p179_p2)
}
   0xa   :  { %s183_s20 = scalar_lea.vmem %s17_s10, 256  ;;  %p188_p4 = scmp.lt.s32.totalorder %s17_s10, %s17_s10 }
   0xb   :  { %p184_p3 = scmp.ne.s32.totalorder %s17_s10, %s183_s20  ;;  %p189_p5 = scmp.lt.s32.totalorder %s183_s20, %s183_s20 }
   0xd   :  { %p190_p6 = por %p189_p5, %p188_p4 }
   0xf   :  { %p191_p7 = pnand %p190_p6, %p184_p3 }
  0x11   :  { %194 = shalt.err (!%p191_p7)
}
  0x12   :  { %19 = dma.hbm_to_vmem [thread:$0]  %s314_s0, 256, %s17_s10, [#allocation3]  }
  0x13   :  { %s195_s25 = scalar_lea.hbm %s315_s1, 64 }
  0x14   :  { %p196_p8 = scmp.ne.s32.totalorder %s315_s1, %s195_s25  ;;  %p199_p9 = scmp.lt.u32.totalorder %s195_s25, %s315_s1 }
  0x16   :  { %p201_p10 = pnand %p199_p9, %p196_p8 }
  0x18   :  { %204 = shalt.err (!%p201_p10)
}
  0x19   :  { %s205_s30 = scalar_lea.vmem %s27_s12, 64  ;;  %p210_p12 = scmp.lt.s32.totalorder %s27_s12, %s27_s12 }
  0x1a   :  { %p206_p11 = scmp.ne.s32.totalorder %s27_s12, %s205_s30  ;;  %p211_p13 = scmp.lt.s32.totalorder %s205_s30, %s205_s30 }
  0x1c   :  { %p212_p0 = por %p211_p13, %p210_p12 }
  0x1e   :  { %p213_p1 = pnand %p212_p0, %p206_p11 }
  0x20   :  { %216 = shalt.err (!%p213_p1)
}
  0x21   :  { %29 = dma.hbm_to_vmem [thread:$0]  %s315_s1, 64, %s27_s12, [#allocation6]  }
  0x22   :  { %239 = dma.done.wait [#allocation3], 256  }
  0x23   :  { %240 = vsyncadd [#allocation3], 4294967040 }
  0x24   :  { %241 = dma.done.wait [#allocation6], 64  }
  0x25   :  { %242 = vsyncadd [#allocation6], 4294967232  ;;  %v288_v0 = vld [vmem:[#allocation2] sm:$0xff]  ;;  %v290_v1 = vld [vmem:[#allocation2 + $0x8] sm:$0xff]  ;;  %v247_v40 = vmov 1966171168   ;;  %v85_v42 = vlaneseq }
  0x26   :  { %v38_v2 = vrot.slane %v288_v0, 4  ;;  %v44_v3 = vrot.slane %v290_v1, 4  ;;  %v52_v4 = vmul.f32 %v288_v0, %v288_v0  ;;  %v53_v5 = vmul.f32 %v290_v1, %v290_v1  ;;  %v78_v50 = vld [vmem:[#allocation5] ss:$2 sm:$0x3]  ;;  %s248_s1 = smov [#allocation7]  }
  0x27   :  { %v83_v41 = vunpack.c.l.s4 %v247_v40  ;;  %v86_v44 = vshrl.u32 %v85_v42, 7  ;;  %v99_v61 = vld [vmem:[#allocation5 + $0x1] ss:$2 sm:$0x3]  ;;  %s155_s4 = sshll.u32 %s248_s1, 4  ;;  %s156_s4 = int_to_ptr.vmem [resolvable:$true] %s155_s4 }
  0x28   :  { %v39_v6 = vadd.f32 %v38_v2, %v288_v0  ;;  %v45_v7 = vadd.f32 %v44_v3, %v290_v1  ;;  %v54_v8 = vrot.slane %v52_v4, 4  ;;  %v60_v9 = vrot.slane %v53_v5, 4  ;;  %s217_s5 = scalar_lea.vmem %s156_s4, 256  ;;  %p222_p3 = scmp.lt.s32.totalorder %s156_s4, %s156_s4 }
  0x29   :  { %v84_v43 = vunpack.c.0.s8 %v83_v41  ;;  %v103_v52 = vsub.s32 0, %v86_v44  ;;  %v107_v53 = vsub.s32 1, %v86_v44  ;;  %p218_p2 = scmp.ne.s32.totalorder %s156_s4, %s217_s5  ;;  %p223_p4 = scmp.lt.s32.totalorder %s217_s5, %s217_s5 }
  0x2a   :  { %v40_v10 = vrot.slane %v39_v6, 2  ;;  %v46_v11 = vrot.slane %v45_v7, 2  ;;  %v55_v12 = vadd.f32 %v54_v8, %v52_v4  ;;  %v61_v13 = vadd.f32 %v60_v9, %v53_v5 }
  0x2b   :  { %v87_v46 = vsub.s32 %v84_v43, %v86_v44  ;;  %p224_p5 = por %p223_p4, %p222_p3 }
  0x2c   :  { %v41_v14 = vadd.f32 %v40_v10, %v39_v6  ;;  %v47_v15 = vadd.f32 %v46_v11, %v45_v7  ;;  %v56_v16 = vrot.slane %v55_v12, 2  ;;  %v62_v17 = vrot.slane %v61_v13, 2 }
  0x2d   :  { %p225_p6 = pnand %p224_p5, %p218_p2 }
  0x2e   :  { %v42_v18 = vrot.slane %v41_v14, 1  ;;  %v48_v19 = vrot.slane %v47_v15, 1  ;;  %v57_v20 = vadd.f32 %v56_v16, %v55_v12  ;;  %v63_v21 = vadd.f32 %v62_v17, %v61_v13 }
  0x30   :  { %v43_v22 = vadd.f32 %v42_v18, %v41_v14  ;;  %v49_v23 = vadd.f32 %v48_v19, %v47_v15  ;;  %v58_v24 = vrot.slane %v57_v20, 1  ;;  %v64_v25 = vrot.slane %v63_v21, 1 }
  0x32   :  { %v50_v26 = vmul.f32 0.125, %v43_v22  ;;  %v51_v27 = vmul.f32 0.125, %v49_v23  ;;  %v59_v28 = vadd.f32 %v58_v24, %v57_v20  ;;  %v65_v29 = vadd.f32 %v64_v25, %v63_v21 }
  0x34   :  { %v66_v30 = vmul.f32 0.125, %v59_v28  ;;  %v67_v31 = vmul.f32 0.125, %v65_v29  ;;  %v68_v32 = vmul.f32 %v50_v26, %v50_v26  ;;  %v69_v33 = vmul.f32 %v51_v27, %v51_v27 }
  0x36   :  { %v70_v34 = vsub.f32 %v66_v30, %v68_v32  ;;  %v71_v35 = vsub.f32 %v67_v31, %v69_v33 }
  0x38   :  { %v72_v36 = vmax.f32 %v70_v34, 0.0  ;;  %v73_v37 = vmax.f32 %v71_v35, 0.0 }
  0x3a   :  { %v74_v38 = vadd.f32 1e-05, %v72_v36  ;;  %v75_v39 = vadd.f32 1e-05, %v73_v37 }
  0x3c   :  { %169 = vrsqrt.f32 %v74_v38 }
  0x3d   :  { %171 = vrsqrt.f32 %v75_v39 }
  0x46   :  { %v170_v45 = vpop.eup %169 }
  0x47   :  { %v172_v47 = vpop.eup %171 }
  0x48   :  { %v81_v48 = vcombine.low %v170_v45, %v172_v47 }
  0x4a   :  { %v88_v49 = vrot.slane %v81_v48, %v87_v46 }
  0x4c   :  { %v95_v51 = vrot.slane %v88_v49, %v87_v46 }
  0x4e   :  { %v97_v54 = vmul.f32 %v95_v51, %v78_v50 }
  0x50   :  { %v104_v55 = vrot.slane %v97_v54, %v103_v52  ;;  %v108_v56 = vrot.slane %v97_v54, %v107_v53 }
  0x52   :  { %v111_v57 = vmul.f32 %v104_v55, %v50_v26  ;;  %v112_v58 = vmul.f32 %v108_v56, %v51_v27  ;;  %v132_v2 = vmul.f32 %v104_v55, %v288_v0  ;;  %v133_v3 = vmul.f32 %v108_v56, %v290_v1 }
  0x54   :  { %v115_v59 = vcombine.low %v111_v57, %v112_v58 }
  0x56   :  { %v122_v60 = vrot.slane %v115_v59, %v87_v46 }
  0x58   :  { %v129_v62 = vrot.slane %v122_v60, %v87_v46 }
  0x5a   :  { %v131_v63 = vsub.f32 %v99_v61, %v129_v62 }
  0x5c   :  { %v138_v4 = vrot.slane %v131_v63, %v103_v52  ;;  %v142_v5 = vrot.slane %v131_v63, %v107_v53 }
  0x5e   :  { %v145_v6 = vadd.f32 %v138_v4, %v132_v2  ;;  %v146_v7 = vadd.f32 %v142_v5, %v133_v3 }
  0x60   :  { %147 = vst [vmem:[#allocation7] sm:$0xff] %v145_v6  ;;  %148 = vst [vmem:[#allocation7 + $0x8] sm:$0xff] %v146_v7 }
  0x61   :  { %228 = shalt.err (!%p225_p6)
}
  0x62   :  { %s229_s8 = scalar_lea.hbm %s316_s2, 256 }
  0x63   :  { %p230_p7 = scmp.ne.s32.totalorder %s316_s2, %s229_s8  ;;  %p233_p8 = scmp.lt.u32.totalorder %s229_s8, %s316_s2 }
  0x65   :  { %p235_p9 = pnand %p233_p8, %p230_p7 }
  0x67   :  { %238 = shalt.err (!%p235_p9)
}
  0x68   :  { %158 = dma.vmem_to_hbm [thread:$0]  %s156_s4, 256, %s316_s2, [#allocation4]  }
  0x69   :  { %243 = dma.done.wait [#allocation4], 256  }
  0x6a   :  { %244 = vsyncadd [#allocation4], 4294967040 }
  0x6b   :  { %162 = vsyncpa [#allocation3], 1 }
  0x6c   :  { %163 = vsyncpa [#allocation6], 1 }
  0x6d   :  { %164 = vsyncpa [#allocation4], 1 }

</bundles_post_ra>
